<compile_context>
chip_gen: v7x
topology: tpu7x:2x2x1
jax: 0.10.0
libtpu: 0.0.40
codegen_flags: <defaults>
</compile_context>

<pallas_src>
import functools

import jax
import jax.numpy as jnp
from jax.experimental import pallas as pl
from jax.experimental.pallas import tpu as pltpu


def _round_down(x, m):
    return (x // m) * m


# ---------------------------------------------------------------------------
# Kernel 1: relation projection partials
#   partial[p] = sum over this split's K-range of  kron(r, bn0(e1)) @ W.reshape(D*D, D)
# Grid: (proj_splits [parallel], steps_per_split [arbitrary reduction]).
# ---------------------------------------------------------------------------
def tucker_project_kernel(kron_ref, w_ref, x1_ref, acc_ref, *,
                          total_k, tile_k, steps_total, steps_per_split,
                          num_splits):
    p = pl.program_id(0)
    k = pl.program_id(1)
    gstep = p * steps_per_split + k          # global reduction step index

    @pl.when(k == 0)
    def _init():
        acc_ref[...] = jnp.zeros_like(acc_ref)

    def accum(kron, w):
        acc_ref[...] += jnp.dot(kron, w, preferred_element_type=jnp.float32)

    last = steps_total - 1
    has_tail = (total_k % tile_k) != 0
    needs_skip = num_splits * steps_per_split > steps_total

    if has_tail:
        # Full tiles: unmasked MXU accumulate (no per-step masking cost).
        @pl.when(gstep < last)
        def _full():
            accum(kron_ref[...], w_ref[...])

        # Only the last real step masks; OOB block contents are undefined, so
        # BOTH operands are zeroed (0 * <undefined> could be NaN otherwise).
        @pl.when(gstep == last)
        def _tail():
            start = last * tile_k
            col = start + jax.lax.broadcasted_iota(jnp.int32, (1, tile_k), 1)
            row = start + jax.lax.broadcasted_iota(jnp.int32, (tile_k, 1), 0)
            kron = jnp.where(col < total_k, kron_ref[...], 0)
            w = jnp.where(row < total_k, w_ref[...], 0)
            accum(kron, w)
        # gstep > last (uneven split) falls through: skip.
    else:
        if needs_skip:
            @pl.when(gstep < steps_total)
            def _():
                accum(kron_ref[...], w_ref[...])
        else:
            accum(kron_ref[...], w_ref[...])

    @pl.when(k == steps_per_split - 1)
    def _finalize():
        x1_ref[...] = acc_ref[...].astype(x1_ref.dtype)


# ---------------------------------------------------------------------------
# Kernel 2: scoring  pred_tile = sigmoid(x1 @ emb_e_tile^T)
# emb_e streamed un-transposed (contraction over its last dim), lane-dense out.
# ---------------------------------------------------------------------------
def tucker_score_kernel(x1_ref, e_ref, out_ref):
    logits = jax.lax.dot_general(
        x1_ref[...], e_ref[...],
        dimension_numbers=(((1,), (1,)), ((), ())),
        preferred_element_type=jnp.float32)
    out_ref[...] = jax.nn.sigmoid(logits).astype(out_ref.dtype)


# ---------------------------------------------------------------------------
# One-time weight preparation (model load).  Avoids per-call casts of the big
# tables (entity table, D^3 core tensor) and pre-folds BatchNorm running stats.
# ---------------------------------------------------------------------------
def prepare_tucker_params(emb_e, emb_rel, W, bn0_params, bn1_params, *,
                          score_dtype=jnp.bfloat16, core_dtype=jnp.bfloat16,
                          eps=1e-5):
    D = emb_e.shape[1]
    g0, be0, m0, v0 = bn0_params
    g1, be1, m1, v1 = bn1_params
    s0 = g0 / jnp.sqrt(v0 + eps)
    s1 = g1 / jnp.sqrt(v1 + eps)
    return dict(
        emb_e=emb_e,                                    # f32: e1 gather + BN stay exact
        emb_rel=emb_rel,
        emb_e_score=emb_e.astype(score_dtype),          # streamed by scoring kernel
        W_flat=W.reshape(D * D, D).astype(core_dtype),  # streamed by projection kernel
        bn0_scale=s0, bn0_shift=be0 - m0 * s0,
        bn1_scale=s1.reshape(1, D), bn1_shift=(be1 - m1 * s1).reshape(1, D),
    )


def tucker_forward(e1_idx, r_idx, params, *, tile_ne=4096, tile_k=None,
                   proj_splits=None, out_dtype=jnp.float32):
    emb_e = params["emb_e"]
    emb_rel = params["emb_rel"]
    emb_e_score = params["emb_e_score"]
    W_flat = params["W_flat"]

    B = e1_idx.shape[0]
    NE, D = emb_e.shape
    K = D * D

    # ---- glue (O(B*D) .. O(B*D^2)): gathers, BN0, kron features -------------
    e1 = jnp.take(emb_e, e1_idx, axis=0)                         # (B, D)
    r = jnp.take(emb_rel, r_idx, axis=0)                         # (B, D)
    x0 = e1 * params["bn0_scale"] + params["bn0_shift"]          # bn0, eval mode

    # kron[b, k*D + i] = r[b, k] * x0[b, i]   ->   x1 = kron @ W.reshape(D*D, D)
    # NOTE: for production batch sizes (B ~ 128) this (B, D*D) feature matrix
    # should be formed inside the projection kernel (free VPU filler under the
    # W DMA) to avoid an O(B*D^2) HBM round trip; at tiny B the wrapper is fine.
    kron = (r[:, :, None] * x0[:, None, :]).reshape(B, K).astype(W_flat.dtype)

    # ---- projection tiling ---------------------------------------------------
    w_bytes = jnp.dtype(W_flat.dtype).itemsize
    if tile_k is None:
        # ~2 MiB per W tile: amortizes per-grid-step overhead while the
        # double-buffered working set stays well under every generation's
        # scoped-VMEM default (v5e 16 MiB / v6e 32 MiB / v7x 32 MiB).
        tile_k = (2 * 1024 * 1024) // max(D * w_bytes, 1)
    tile_k = min(max(int(tile_k), 1), K)
    if tile_k != K:
        tile_k = _round_down(tile_k, 128)
        if tile_k == 0:
            tile_k = K
    steps_total = pl.cdiv(K, tile_k)

    if proj_splits is None:
        # Split the K reduction across both v7x TensorCores when there is
        # enough work; on single-TC v5e/v6e the extra partial-sum is negligible.
        proj_splits = 2 if steps_total >= 4 else 1
    proj_splits = max(1, min(int(proj_splits), steps_total))
    steps_per_split = pl.cdiv(steps_total, proj_splits)

    def kron_map(p, k):
        return (0, jnp.minimum(p * steps_per_split + k, steps_total - 1))

    def w_map(p, k):
        return (jnp.minimum(p * steps_per_split + k, steps_total - 1), 0)

    proj_kernel = functools.partial(
        tucker_project_kernel, total_k=K, tile_k=tile_k,
        steps_total=steps_total, steps_per_split=steps_per_split,
        num_splits=proj_splits)

    proj_cost = pl.CostEstimate(
        flops=2 * B * K * D,
        transcendentals=0,
        bytes_accessed=(B * K * w_bytes + K * D * w_bytes
                        + proj_splits * B * D * 4))

    partials = pl.pallas_call(
        proj_kernel,
        out_shape=jax.ShapeDtypeStruct((proj_splits, B, D), jnp.float32),
        grid=(proj_splits, steps_per_split),
        in_specs=[
            pl.BlockSpec((B, tile_k), kron_map),          # kron features tile
            pl.BlockSpec((tile_k, D), w_map),             # core-tensor tile
        ],
        out_specs=pl.BlockSpec((None, B, D), lambda p, k: (p, 0, 0)),
        scratch_shapes=[pltpu.VMEM((B, D), jnp.float32)],
        compiler_params=pltpu.CompilerParams(
            dimension_semantics=("parallel", "arbitrary")),
        cost_estimate=proj_cost,
    )(kron, W_flat)

    # Sum split partials, then the folded bn1 affine (O(B*D) glue).
    x1 = partials.sum(axis=0) * params["bn1_scale"] + params["bn1_shift"]
    x1s = x1.astype(emb_e_score.dtype)                           # (B, D), negligible

    # ---- scoring over all entities: wide lane-dense tiles --------------------
    e_bytes = jnp.dtype(emb_e_score.dtype).itemsize
    tile = min(int(tile_ne), NE)
    if tile != NE:
        tile = max(128, _round_down(tile, 128))
        # Keep >= ~8 grid steps so the parallel axis load-balances across the
        # two v7x TensorCores and DMA/compute pipelining keeps depth.
        cap = _round_down(NE // 8, 128)
        if cap >= 128:
            tile = min(tile, cap)
    tile_ne = tile

    score_cost = pl.CostEstimate(
        flops=2 * B * D * NE,
        transcendentals=B * NE,                            # sigmoid
        bytes_accessed=(B * D * e_bytes + NE * D * e_bytes
                        + B * NE * jnp.dtype(out_dtype).itemsize))

    pred = pl.pallas_call(
        tucker_score_kernel,
        out_shape=jax.ShapeDtypeStruct((B, NE), out_dtype),
        grid=(pl.cdiv(NE, tile_ne),),
        in_specs=[
            pl.BlockSpec((B, D), lambda j: (0, 0)),        # x1 (tiny, constant)
            pl.BlockSpec((tile_ne, D), lambda j: (j, 0)),  # entity-table tile
        ],
        out_specs=pl.BlockSpec((B, tile_ne), lambda j: (0, j)),
        compiler_params=pltpu.CompilerParams(
            dimension_semantics=("parallel",)),
        cost_estimate=score_cost,
    )(x1s, emb_e_score)
    return pred


def tucker_reference(e1_idx, r_idx, emb_e, emb_rel, W, bn0_params, bn1_params):
    eps = 1e-5
    (g0, be0, m0, v0) = bn0_params
    (g1, be1, m1, v1) = bn1_params
    D = emb_e.shape[1]
    e1 = emb_e[e1_idx]
    x = (e1 - m0) / jnp.sqrt(v0 + eps) * g0 + be0
    r = emb_rel[r_idx]
    W_mat = (r @ W.reshape(D, D * D)).reshape(-1, D, D)
    x = jnp.einsum('bi,bij->bj', x, W_mat)
    x = (x - m1) / jnp.sqrt(v1 + eps) * g1 + be1
    return jax.nn.sigmoid(x @ emb_e.T)


if __name__ == "__main__":
    # batch, embedding_dim, num_entities (deliberately NOT a tile multiple), num_relations
    B, D, NE, NR = 8, 32, 1000, 16

    key = jax.random.PRNGKey(0)
    k_e, k_r, k_w, k_i1, k_i2 = jax.random.split(key, 5)

    # xavier_normal-style embeddings, uniform(-1, 1) core tensor (per __init__)
    emb_e = jax.random.normal(k_e, (NE, D), jnp.float32) * jnp.sqrt(2.0 / (NE + D))
    emb_rel = jax.random.normal(k_r, (NR, D), jnp.float32) * jnp.sqrt(2.0 / (NR + D))
    W = jax.random.uniform(k_w, (D, D, D), jnp.float32, minval=-1.0, maxval=1.0)

    # Non-trivial BatchNorm running stats / affine params (eval mode)
    ar = jnp.arange(D, dtype=jnp.float32)
    bn0_params = (1.0 + 0.02 * ar, 0.01 * ar, 0.005 * (ar - D / 2), 1.0 + 0.03 * ar)
    bn1_params = (1.0 - 0.01 * ar, -0.02 * ar, 0.004 * (ar - D / 2), 1.2 + 0.02 * ar)

    e1_idx = jax.random.randint(k_i1, (B,), 0, NE)
    r_idx = jax.random.randint(k_i2, (B,), 0, NR)

    ref = tucker_reference(e1_idx, r_idx, emb_e, emb_rel, W, bn0_params, bn1_params)

    # 1) all-f32 parity path (default tiles: single K block, single NE block here)
    params_f32 = prepare_tucker_params(emb_e, emb_rel, W, bn0_params, bn1_params,
                                       score_dtype=jnp.float32,
                                       core_dtype=jnp.float32)
    pred_f32 = jax.block_until_ready(tucker_forward(e1_idx, r_idx, params_f32))
    assert pred_f32.shape == (B, NE)
    assert jnp.allclose(pred_f32, ref, atol=1e-5, rtol=1e-5), "f32 path mismatch"

    # 1b) exercise K tiling + 2-way reduction split + gated tail masking +
    #     partial entity tiles (still f32 for tight tolerance).
    pred_split = jax.block_until_ready(
        tucker_forward(e1_idx, r_idx, params_f32,
                       tile_k=384, proj_splits=2, tile_ne=256))
    assert pred_split.shape == (B, NE)
    assert jnp.allclose(pred_split, ref, atol=1e-5, rtol=1e-5), "split path mismatch"

    # 2) production path: bf16-resident entity table & core tensor, prepared once
    #    (no per-call casts of the big tables), default large tiles.
    params = prepare_tucker_params(emb_e, emb_rel, W, bn0_params, bn1_params)
    pred_bf16 = jax.block_until_ready(tucker_forward(e1_idx, r_idx, params))
    assert pred_bf16.shape == (B, NE)
    assert jnp.allclose(pred_bf16, ref, atol=2e-3, rtol=0.0), "bf16 path mismatch"

    print("KERNEL_OK")
</pallas_src>

<mosaic_0001>
module attributes {stable_mosaic.version = 11 : i64} {
  func.func @tucker_project_kernel(%arg0: i32, %arg1: i32, %arg2: memref<8x1024xf32, #tpu.memory_space<vmem>>, %arg3: memref<1024x32xf32, #tpu.memory_space<vmem>>, %arg4: memref<1x8x32xf32, #tpu.memory_space<vmem>>, %arg5: memref<8x32xf32, #tpu.memory_space<vmem>>) attributes {dimension_semantics = [#tpu.dimension_semantics<parallel>, #tpu.dimension_semantics<arbitrary>], iteration_bounds = array<i64: 1, 1>, scalar_prefetch = 0 : i64, scratch_operands = 1 : i64, tpu.core_type = #tpu.core_type<tc>, window_params = [{transform_indices = @transform_0, window_bounds = array<i64: 8, 1024>}, {transform_indices = @transform_1, window_bounds = array<i64: 1024, 32>}, {transform_indices = @transform_2, window_bounds = array<i64: 1, 8, 32>}]} {
    %c0_i32 = arith.constant 0 : i32
    %0 = arith.cmpi eq, %arg1, %c0_i32 : i32
    %1 = arith.extui %0 : i1 to i32
    %c0_i32_0 = arith.constant 0 : i32
    %2 = arith.cmpi ne, %1, %c0_i32_0 : i32
    scf.if %2 {
      %cst_10 = arith.constant 0.000000e+00 : f32
      %12 = vector.broadcast %cst_10 : f32 to vector<8x32xf32>
      %c0_11 = arith.constant 0 : index
      %c0_12 = arith.constant 0 : index
      %13 = vector.load %arg5[%c0_11, %c0_12] : memref<8x32xf32, #tpu.memory_space<vmem>>, vector<8x32xf32>
      tpu.vector_store %arg5[%c0_11, %c0_12], %12 {strides = array<i32>} : memref<8x32xf32, #tpu.memory_space<vmem>>, vector<8x32xf32>,
    } else {
    }
    %c0 = arith.constant 0 : index
    %c0_1 = arith.constant 0 : index
    %3 = vector.load %arg2[%c0, %c0_1] : memref<8x1024xf32, #tpu.memory_space<vmem>>, vector<8x1024xf32>
    %c0_2 = arith.constant 0 : index
    %c0_3 = arith.constant 0 : index
    %4 = vector.load %arg3[%c0_2, %c0_3] : memref<1024x32xf32, #tpu.memory_space<vmem>>, vector<1024x32xf32>
    %c0_4 = arith.constant 0 : index
    %c0_5 = arith.constant 0 : index
    %5 = vector.load %arg5[%c0_4, %c0_5] : memref<8x32xf32, #tpu.memory_space<vmem>>, vector<8x32xf32>
    %cst = arith.constant dense<0.000000e+00> : vector<8x32xf32>
    %6 = tpu.matmul %3, %4, %cst {dimension_numbers = #tpu.dot_dimension_numbers<[1], [0], [0], [1], [0, 0, 1, 1], [], []>} : vector<8x1024xf32>, vector<1024x32xf32>, vector<8x32xf32> -> vector<8x32xf32>
    %7 = arith.addf %5, %6 : vector<8x32xf32>
    %c0_6 = arith.constant 0 : index
    %c0_7 = arith.constant 0 : index
    %8 = vector.load %arg5[%c0_6, %c0_7] : memref<8x32xf32, #tpu.memory_space<vmem>>, vector<8x32xf32>
    tpu.vector_store %arg5[%c0_6, %c0_7], %7 {strides = array<i32>} : memref<8x32xf32, #tpu.memory_space<vmem>>, vector<8x32xf32>,
    %c0_i32_8 = arith.constant 0 : i32
    %9 = arith.cmpi eq, %arg1, %c0_i32_8 : i32
    %10 = arith.extui %9 : i1 to i32
    %c0_i32_9 = arith.constant 0 : i32
    %11 = arith.cmpi ne, %10, %c0_i32_9 : i32
    scf.if %11 {
      %c0_10 = arith.constant 0 : index
      %c0_11 = arith.constant 0 : index
      %12 = vector.load %arg5[%c0_10, %c0_11] : memref<8x32xf32, #tpu.memory_space<vmem>>, vector<8x32xf32>
      %c0_12 = arith.constant 0 : index
      %c0_13 = arith.constant 0 : index
      %c0_14 = arith.constant 0 : index
      %13 = vector.load %arg4[%c0_12, %c0_13, %c0_14] : memref<1x8x32xf32, #tpu.memory_space<vmem>>, vector<1x8x32xf32>
      %14 = vector.shape_cast %13 : vector<1x8x32xf32> to vector<8x32xf32>
      %15 = vector.shape_cast %12 : vector<8x32xf32> to vector<1x8x32xf32>
      tpu.vector_store %arg4[%c0_12, %c0_13, %c0_14], %15 {strides = array<i32>} : memref<1x8x32xf32, #tpu.memory_space<vmem>>, vector<1x8x32xf32>,
    } else {
    }
    return
  }
  func.func @transform_0(%arg0: i32, %arg1: i32) -> (i32, i32) {
    %c1_i32 = arith.constant 1 : i32
    %0 = arith.muli %arg0, %c1_i32 : i32
    %1 = arith.addi %0, %arg1 : i32
    %c0_i32 = arith.constant 0 : i32
    %2 = arith.minsi %1, %c0_i32 : i32
    %c0_i32_0 = arith.constant 0 : i32
    %c0_i32_1 = arith.constant 0 : i32
    return %c0_i32_0, %2 : i32, i32
  }
  func.func @transform_1(%arg0: i32, %arg1: i32) -> (i32, i32) {
    %c1_i32 = arith.constant 1 : i32
    %0 = arith.muli %arg0, %c1_i32 : i32
    %1 = arith.addi %0, %arg1 : i32
    %c0_i32 = arith.constant 0 : i32
    %2 = arith.minsi %1, %c0_i32 : i32
    %c0_i32_0 = arith.constant 0 : i32
    %c0_i32_1 = arith.constant 0 : i32
    return %2, %c0_i32_0 : i32, i32
  }
  func.func @transform_2(%arg0: i32, %arg1: i32) -> (i32, i32, i32) {
    %c0_i32 = arith.constant 0 : i32
    %c0_i32_0 = arith.constant 0 : i32
    %c0_i32_1 = arith.constant 0 : i32
    return %arg0, %c0_i32, %c0_i32_0 : i32, i32, i32
  }
}

</mosaic_0001>

<bundles_post_ra>
// kernel: tpu_custom_call.1
= control target key start
LH: loop header
LB: loop body
LE: loop exit
PB: predicated region body
PF: predicated region fallthrough
CT: control target
= control target key end

     0   :  { %s1267_s0 = inlined_call_operand.vmem [shape: f32[8,1024], index: 0, kind: input, shape index: {}]   ;;  %s1268_s1 = inlined_call_operand.vmem [shape: f32[1024,32], index: 1, kind: input, shape index: {}]   ;;  %s1269_s2 = inlined_call_operand.hbm [shape: f32[1,8,32], index: 2, kind: output, shape index: {}]  }
   0x1   :  { %v106_v0 = vld [vmem:[%s1268_s1 + $0x80] sm:$0xff]  ;;  %v107_v1 = vld [vmem:[%s1268_s1 + $0x88] sm:$0xff]  ;;  %v108_v11 = vld [vmem:[%s1268_s1 + $0x90] sm:$0xff] }
   0x2   :  { %v138_v2 = vld [vmem:[%s1268_s1 + $0x180] sm:$0xff]  ;;  %v673_v3 = vpack.c.bf16 %v107_v1, %v106_v0  ;;  %v139_v4 = vld [vmem:[%s1268_s1 + $0x188] sm:$0xff]  ;;  %v109_v13 = vld [vmem:[%s1268_s1 + $0x98] sm:$0xff] }
   0x3   :  { %v90_v5 = vld [vmem:[%s1268_s1] sm:$0xff]  ;;  %v91_v6 = vld [vmem:[%s1268_s1 + $0x8] sm:$0xff]  ;;  %v705_v7 = vpack.c.bf16 %v139_v4, %v138_v2  ;;  %v140_v14 = vld [vmem:[%s1268_s1 + $0x190] sm:$0xff]  ;;  %v677_v16 = vpack.c.bf16 %v109_v13, %v108_v11 }
   0x4   :  { %v675_v8 = vpack.c.bf16 %v91_v6, %v90_v5  ;;  %v122_v9 = vld [vmem:[%s1268_s1 + $0x100] sm:$0xff]  ;;  %v123_v10 = vld [vmem:[%s1268_s1 + $0x108] sm:$0xff]  ;;  %674 = vmatprep.subr.bf16.mxu0 %v673_v3  ;;  %v141_v15 = vld [vmem:[%s1268_s1 + $0x198] sm:$0xff] }
   0x5   :  { %v707_v12 = vpack.c.bf16 %v123_v10, %v122_v9  ;;  %706 = vmatprep.subr.bf16.mxu1 %v705_v7  ;;  %v709_v17 = vpack.c.bf16 %v141_v15, %v140_v14  ;;  %v92_v18 = vld [vmem:[%s1268_s1 + $0x10] sm:$0xff]  ;;  %v93_v19 = vld [vmem:[%s1268_s1 + $0x18] sm:$0xff]  ;;  %v110_v23 = vld [vmem:[%s1268_s1 + $0xa0] sm:$0xff] }
   0x6   :  { %676 = vmatpush3.bf16.msra.mxu0 %v675_v8  ;;  %v124_v20 = vld [vmem:[%s1268_s1 + $0x110] sm:$0xff]  ;;  %v679_v21 = vpack.c.bf16 %v93_v19, %v92_v18  ;;  %v125_v22 = vld [vmem:[%s1268_s1 + $0x118] sm:$0xff]  ;;  %v111_v24 = vld [vmem:[%s1268_s1 + $0xa8] sm:$0xff] }
   0x7   :  { %708 = vmatpush3.bf16.msra.mxu1 %v707_v12  ;;  %678 = vmatprep.subr.bf16.mxu0 %v677_v16  ;;  %v711_v25 = vpack.c.bf16 %v125_v22, %v124_v20  ;;  %v681_v26 = vpack.c.bf16 %v111_v24, %v110_v23  ;;  %v142_v27 = vld [vmem:[%s1268_s1 + $0x1a0] sm:$0xff]  ;;  %v143_v28 = vld [vmem:[%s1268_s1 + $0x1a8] sm:$0xff]  ;;  %v112_v35 = vld [vmem:[%s1268_s1 + $0xb0] sm:$0xff] }
   0x8   :  { %710 = vmatprep.subr.bf16.mxu1 %v709_v17  ;;  %v94_v29 = vld [vmem:[%s1268_s1 + $0x20] sm:$0xff]  ;;  %v713_v30 = vpack.c.bf16 %v143_v28, %v142_v27  ;;  %v95_v31 = vld [vmem:[%s1268_s1 + $0x28] sm:$0xff]  ;;  %v113_v36 = vld [vmem:[%s1268_s1 + $0xb8] sm:$0xff] }
   0x9   :  { %v126_v32 = vld [vmem:[%s1268_s1 + $0x120] sm:$0xff]  ;;  %v127_v33 = vld [vmem:[%s1268_s1 + $0x128] sm:$0xff]  ;;  %v683_v34 = vpack.c.bf16 %v95_v31, %v94_v29  ;;  %v144_v37 = vld [vmem:[%s1268_s1 + $0x1b0] sm:$0xff]  ;;  %v685_v39 = vpack.c.bf16 %v113_v36, %v112_v35 }
   0xa   :  { %680 = vmatpush3.bf16.msra.mxu0 %v679_v21  ;;  %v715_v38 = vpack.c.bf16 %v127_v33, %v126_v32  ;;  %v145_v40 = vld [vmem:[%s1268_s1 + $0x1b8] sm:$0xff]  ;;  %v96_v41 = vld [vmem:[%s1268_s1 + $0x30] sm:$0xff]  ;;  %v114_v46 = vld [vmem:[%s1268_s1 + $0xc0] sm:$0xff] }
   0xb   :  { %712 = vmatpush3.bf16.msra.mxu1 %v711_v25  ;;  %682 = vmatprep.subr.bf16.mxu0 %v681_v26  ;;  %v97_v42 = vld [vmem:[%s1268_s1 + $0x38] sm:$0xff]  ;;  %v717_v43 = vpack.c.bf16 %v145_v40, %v144_v37  ;;  %v128_v44 = vld [vmem:[%s1268_s1 + $0x130] sm:$0xff]  ;;  %v115_v47 = vld [vmem:[%s1268_s1 + $0xc8] sm:$0xff] }
   0xc   :  { %714 = vmatprep.subr.bf16.mxu1 %v713_v30  ;;  %v129_v45 = vld [vmem:[%s1268_s1 + $0x138] sm:$0xff]  ;;  %v146_v48 = vld [vmem:[%s1268_s1 + $0x1c0] sm:$0xff]  ;;  %v147_v49 = vld [vmem:[%s1268_s1 + $0x1c8] sm:$0xff]  ;;  %v687_v50 = vpack.c.bf16 %v97_v42, %v96_v41  ;;  %v689_v52 = vpack.c.bf16 %v115_v47, %v114_v46 }
   0xd   :  { %v719_v51 = vpack.c.bf16 %v129_v45, %v128_v44  ;;  %v98_v53 = vld [vmem:[%s1268_s1 + $0x40] sm:$0xff]  ;;  %v99_v54 = vld [vmem:[%s1268_s1 + $0x48] sm:$0xff]  ;;  %v721_v56 = vpack.c.bf16 %v147_v49, %v146_v48  ;;  %v116_v58 = vld [vmem:[%s1268_s1 + $0xd0] sm:$0xff] }
   0xe   :  { %684 = vmatpush3.bf16.msra.mxu0 %v683_v34  ;;  %v130_v55 = vld [vmem:[%s1268_s1 + $0x140] sm:$0xff]  ;;  %v131_v57 = vld [vmem:[%s1268_s1 + $0x148] sm:$0xff]  ;;  %v117_v59 = vld [vmem:[%s1268_s1 + $0xd8] sm:$0xff]  ;;  %v691_v62 = vpack.c.bf16 %v99_v54, %v98_v53 }
   0xf   :  { %716 = vmatpush3.bf16.msra.mxu1 %v715_v38  ;;  %686 = vmatprep.subr.bf16.mxu0 %v685_v39  ;;  %v148_v60 = vld [vmem:[%s1268_s1 + $0x1d0] sm:$0xff]  ;;  %v149_v61 = vld [vmem:[%s1268_s1 + $0x1d8] sm:$0xff]  ;;  %v723_v63 = vpack.c.bf16 %v131_v57, %v130_v55  ;;  %v693_v0 = vpack.c.bf16 %v117_v59, %v116_v58  ;;  %v118_v6 = vld [vmem:[%s1268_s1 + $0xe0] sm:$0xff] }
  0x10   :  { %718 = vmatprep.subr.bf16.mxu1 %v717_v43  ;;  %v100_v1 = vld [vmem:[%s1268_s1 + $0x50] sm:$0xff]  ;;  %v101_v2 = vld [vmem:[%s1268_s1 + $0x58] sm:$0xff]  ;;  %v725_v4 = vpack.c.bf16 %v149_v61, %v148_v60  ;;  %v119_v7 = vld [vmem:[%s1268_s1 + $0xe8] sm:$0xff] }
  0x11   :  { %v132_v3 = vld [vmem:[%s1268_s1 + $0x150] sm:$0xff]  ;;  %v133_v5 = vld [vmem:[%s1268_s1 + $0x158] sm:$0xff]  ;;  %v150_v8 = vld [vmem:[%s1268_s1 + $0x1e0] sm:$0xff]  ;;  %v695_v10 = vpack.c.bf16 %v101_v2, %v100_v1  ;;  %v697_v14 = vpack.c.bf16 %v119_v7, %v118_v6 }
  0x12   :  { %688 = vmatpush3.bf16.msra.mxu0 %v687_v50  ;;  %v151_v9 = vld [vmem:[%s1268_s1 + $0x1e8] sm:$0xff]  ;;  %v102_v11 = vld [vmem:[%s1268_s1 + $0x60] sm:$0xff]  ;;  %v727_v13 = vpack.c.bf16 %v133_v5, %v132_v3  ;;  %v85_v17 = vld [vmem:[%s1267_s0 + $0x18] sm:$0xff] }
  0x13   :  { %720 = vmatpush3.bf16.msra.mxu1 %v719_v51  ;;  %690 = vmatprep.subr.bf16.mxu0 %v689_v52  ;;  %v103_v12 = vld [vmem:[%s1268_s1 + $0x68] sm:$0xff]  ;;  %v134_v15 = vld [vmem:[%s1268_s1 + $0x160] sm:$0xff]  ;;  %v729_v18 = vpack.c.bf16 %v151_v9, %v150_v8  ;;  %v120_v20 = vld [vmem:[%s1268_s1 + $0xf0] sm:$0xff] }
  0x14   :  { %722 = vmatprep.subr.bf16.mxu1 %v721_v56  ;;  %v83_v16 = vld [vmem:[%s1267_s0 + $0x8] sm:$0xff]  ;;  %v121_v21 = vld [vmem:[%s1268_s1 + $0xf8] sm:$0xff]  ;;  %v152_v22 = vld [vmem:[%s1268_s1 + $0x1f0] sm:$0xff]  ;;  %353 = vmatprep.mubr.f32.mxu1 %v85_v17  ;;  %v699_v24 = vpack.c.bf16 %v103_v12, %v102_v11 }
  0x15   :  { %v135_v19 = vld [vmem:[%s1268_s1 + $0x168] sm:$0xff]  ;;  %283 = vmatprep.mubr.f32.mxu0 %v83_v16  ;;  %v153_v23 = vld [vmem:[%s1268_s1 + $0x1f8] sm:$0xff]  ;;  %v701_v26 = vpack.c.bf16 %v121_v21, %v120_v20  ;;  %v104_v27 = vld [vmem:[%s1268_s1 + $0x70] sm:$0xff] }
  0x16   :  { %692 = vmatpush3.bf16.msra.mxu0 %v691_v62  ;;  %v731_v25 = vpack.c.bf16 %v135_v19, %v134_v15  ;;  %v105_v28 = vld [vmem:[%s1268_s1 + $0x78] sm:$0xff]  ;;  %v136_v29 = vld [vmem:[%s1268_s1 + $0x170] sm:$0xff]  ;;  %v733_v30 = vpack.c.bf16 %v153_v23, %v152_v22  ;;  %v170_v32 = vld [vmem:[%s1268_s1 + $0x280] sm:$0xff] }
  0x17   :  { %724 = vmatpush3.bf16.msra.mxu1 %v723_v63  ;;  %694 = vmatprep.subr.bf16.mxu0 %v693_v0  ;;  %v137_v31 = vld [vmem:[%s1268_s1 + $0x178] sm:$0xff]  ;;  %v171_v33 = vld [vmem:[%s1268_s1 + $0x288] sm:$0xff]  ;;  %v202_v34 = vld [vmem:[%s1268_s1 + $0x380] sm:$0xff]  ;;  %v703_v36 = vpack.c.bf16 %v105_v28, %v104_v27 }
  0x18   :  { %726 = vmatprep.subr.bf16.mxu1 %v725_v4  ;;  %v203_v35 = vld [vmem:[%s1268_s1 + $0x388] sm:$0xff]  ;;  %v735_v37 = vpack.c.bf16 %v137_v31, %v136_v29  ;;  %v737_v38 = vpack.c.bf16 %v171_v33, %v170_v32  ;;  %v154_v39 = vld [vmem:[%s1268_s1 + $0x200] sm:$0xff]  ;;  %v172_v44 = vld [vmem:[%s1268_s1 + $0x290] sm:$0xff] }
  0x19   :  { %v155_v40 = vld [vmem:[%s1268_s1 + $0x208] sm:$0xff]  ;;  %v186_v41 = vld [vmem:[%s1268_s1 + $0x300] sm:$0xff]  ;;  %v769_v42 = vpack.c.bf16 %v203_v35, %v202_v34  ;;  %v173_v45 = vld [vmem:[%s1268_s1 + $0x298] sm:$0xff] }
  0x1a   :  { %696 = vmatpush3.bf16.msra.mxu0 %v695_v10  ;;  %v187_v43 = vld [vmem:[%s1268_s1 + $0x308] sm:$0xff]  ;;  %v204_v46 = vld [vmem:[%s1268_s1 + $0x390] sm:$0xff]  ;;  %v205_v47 = vld [vmem:[%s1268_s1 + $0x398] sm:$0xff]  ;;  %v739_v50 = vpack.c.bf16 %v155_v40, %v154_v39  ;;  %v741_v52 = vpack.c.bf16 %v173_v45, %v172_v44 }
  0x1b   :  { %728 = vmatpush3.bf16.msra.mxu1 %v727_v13  ;;  %698 = vmatprep.subr.bf16.mxu0 %v697_v14  ;;  %v82_v48 = vld [vmem:[%s1267_s0] sm:$0xff]  ;;  %v84_v49 = vld [vmem:[%s1267_s0 + $0x10] sm:$0xff]  ;;  %v771_v51 = vpack.c.bf16 %v187_v43, %v186_v41  ;;  %v157_v54 = vld [vmem:[%s1268_s1 + $0x218] sm:$0xff]  ;;  %v773_v56 = vpack.c.bf16 %v205_v47, %v204_v46 }
  0x1c   :  { %730 = vmatprep.subr.bf16.mxu1 %v729_v18  ;;  %v156_v53 = vld [vmem:[%s1268_s1 + $0x210] sm:$0xff]  ;;  %v189_v57 = vld [vmem:[%s1268_s1 + $0x318] sm:$0xff]  ;;  %v174_v58 = vld [vmem:[%s1268_s1 + $0x2a0] sm:$0xff] }
  0x1d   :  { %v188_v55 = vld [vmem:[%s1268_s1 + $0x310] sm:$0xff]  ;;  %v175_v59 = vld [vmem:[%s1268_s1 + $0x2a8] sm:$0xff]  ;;  %v206_v60 = vld [vmem:[%s1268_s1 + $0x3a0] sm:$0xff]  ;;  %v743_v62 = vpack.c.bf16 %v157_v54, %v156_v53 }
  0x1e   :  { %700 = vmatpush3.bf16.msra.mxu0 %v699_v24  ;;  %v207_v61 = vld [vmem:[%s1268_s1 + $0x3a8] sm:$0xff]  ;;  %v775_v63 = vpack.c.bf16 %v189_v57, %v188_v55  ;;  %v745_v0 = vpack.c.bf16 %v175_v59, %v174_v58  ;;  %v158_v1 = vld [vmem:[%s1268_s1 + $0x220] sm:$0xff]  ;;  %v176_v6 = vld [vmem:[%s1268_s1 + $0x2b0] sm:$0xff] }
  0x1f   :  { %732 = vmatpush3.bf16.msra.mxu1 %v731_v25  ;;  %702 = vmatprep.subr.bf16.mxu0 %v701_v26  ;;  %v159_v2 = vld [vmem:[%s1268_s1 + $0x228] sm:$0xff]  ;;  %v190_v3 = vld [vmem:[%s1268_s1 + $0x320] sm:$0xff]  ;;  %v777_v4 = vpack.c.bf16 %v207_v61, %v206_v60  ;;  %v177_v7 = vld [vmem:[%s1268_s1 + $0x2b8] sm:$0xff] }
  0x20   :  { %734 = vmatprep.subr.bf16.mxu1 %v733_v30  ;;  %v191_v5 = vld [vmem:[%s1268_s1 + $0x328] sm:$0xff]  ;;  %v208_v8 = vld [vmem:[%s1268_s1 + $0x3b0] sm:$0xff]  ;;  %v209_v9 = vld [vmem:[%s1268_s1 + $0x3b8] sm:$0xff]  ;;  %v747_v10 = vpack.c.bf16 %v159_v2, %v158_v1  ;;  %v749_v12 = vpack.c.bf16 %v177_v7, %v176_v6 }
  0x21   :  { %v779_v11 = vpack.c.bf16 %v191_v5, %v190_v3  ;;  %v160_v13 = vld [vmem:[%s1268_s1 + $0x230] sm:$0xff]  ;;  %v161_v14 = vld [vmem:[%s1268_s1 + $0x238] sm:$0xff]  ;;  %v781_v16 = vpack.c.bf16 %v209_v9, %v208_v8  ;;  %v178_v18 = vld [vmem:[%s1268_s1 + $0x2c0] sm:$0xff] }
  0x22   :  { %704 = vmatpush3.bf16.msra.mxu0 %v703_v36  ;;  %v192_v15 = vld [vmem:[%s1268_s1 + $0x330] sm:$0xff]  ;;  %v193_v17 = vld [vmem:[%s1268_s1 + $0x338] sm:$0xff]  ;;  %v179_v19 = vld [vmem:[%s1268_s1 + $0x2c8] sm:$0xff]  ;;  %v751_v22 = vpack.c.bf16 %v161_v14, %v160_v13 }
  0x23   :  { %736 = vmatpush3.bf16.msra.mxu1 %v735_v37  ;;  %738 = vmatprep.subr.bf16.mxu0 %v737_v38  ;;  %v210_v20 = vld [vmem:[%s1268_s1 + $0x3c0] sm:$0xff]  ;;  %v211_v21 = vld [vmem:[%s1268_s1 + $0x3c8] sm:$0xff]  ;;  %v89_v25 = vld [vmem:[%s1267_s0 + $0x38] sm:$0xff]  ;;  %v783_v26 = vpack.c.bf16 %v193_v17, %v192_v15  ;;  %v753_v27 = vpack.c.bf16 %v179_v19, %v178_v18 }
  0x24   :  { %770 = vmatprep.subr.bf16.mxu1 %v769_v42  ;;  %v162_v23 = vld [vmem:[%s1268_s1 + $0x240] sm:$0xff]  ;;  %v87_v24 = vld [vmem:[%s1267_s0 + $0x28] sm:$0xff] }
  0x25   :  { %284 = vmatmul.mubr.f32.vlgmr.msra.gmra.mrb[0].mxu0 %v82_v48  ;;  %v163_v28 = vld [vmem:[%s1268_s1 + $0x248] sm:$0xff]  ;;  %v194_v29 = vld [vmem:[%s1268_s1 + $0x340] sm:$0xff] }
  0x26   :  { %354 = vmatmul.mubr.f32.vlgmr.msra.gmra.mrb[0].mxu1 %v84_v49  ;;  %740 = vmatpush3.bf16.msra.mxu0 %v739_v50 }
  0x27   :  { %772 = vmatpush3.bf16.msra.mxu1 %v771_v51  ;;  %742 = vmatprep.subr.bf16.mxu0 %v741_v52 }
  0x28   :  { %774 = vmatprep.subr.bf16.mxu1 %v773_v56 }
  0x2a   :  { %744 = vmatpush3.bf16.msra.mxu0 %v743_v62 }
  0x2b   :  { %776 = vmatpush3.bf16.msra.mxu1 %v775_v63  ;;  %746 = vmatprep.subr.bf16.mxu0 %v745_v0 }
  0x2c   :  { %778 = vmatprep.subr.bf16.mxu1 %v777_v4 }
  0x2e   :  { %748 = vmatpush3.bf16.msra.mxu0 %v747_v10 }
  0x2f   :  { %780 = vmatpush3.bf16.msra.mxu1 %v779_v11  ;;  %750 = vmatprep.subr.bf16.mxu0 %v749_v12 }
  0x30   :  { %7 = vsyncpa [#allocation4], 0  ;;  %782 = vmatprep.subr.bf16.mxu1 %v781_v16  ;;  %v785_v30 = vpack.c.bf16 %v211_v21, %v210_v20  ;;  %v195_v31 = vld [vmem:[%s1268_s1 + $0x348] sm:$0xff]  ;;  %v180_v32 = vld [vmem:[%s1268_s1 + $0x2d0] sm:$0xff]  ;;  %423 = vmatprep.mubr.f32.mxu0 %v87_v24  ;;  %v755_v36 = vpack.c.bf16 %v163_v28, %v162_v23  ;;  %vm80_vm0 = vcmask 261120   ;;  %v827_v8 = vmov 0.0  }
  0x31   :  { %v181_v33 = vld [vmem:[%s1268_s1 + $0x2d8] sm:$0xff]  ;;  %v212_v34 = vld [vmem:[%s1268_s1 + $0x3d0] sm:$0xff]  ;;  %493 = vmatprep.mubr.f32.mxu1 %v89_v25  ;;  %v787_v37 = vpack.c.bf16 %v195_v31, %v194_v29  ;;  %v182_v44 = vld [vmem:[%s1268_s1 + $0x2e0] sm:$0xff]  ;;  %81 = vst.msk [vmem:[#allocation2] sm:$0xff] %vm80_vm0, %v827_v8 }
  0x32   :  { %v213_v35 = vld [vmem:[%s1268_s1 + $0x3d8] sm:$0xff]  ;;  %752 = vmatpush3.bf16.msra.mxu0 %v751_v22  ;;  %v757_v38 = vpack.c.bf16 %v181_v33, %v180_v32  ;;  %v164_v39 = vld [vmem:[%s1268_s1 + $0x250] sm:$0xff]  ;;  %v183_v45 = vld [vmem:[%s1268_s1 + $0x2e8] sm:$0xff] }
  0x33   :  { %784 = vmatpush3.bf16.msra.mxu1 %v783_v26  ;;  %754 = vmatprep.subr.bf16.mxu0 %v753_v27  ;;  %v165_v40 = vld [vmem:[%s1268_s1 + $0x258] sm:$0xff]  ;;  %v196_v41 = vld [vmem:[%s1268_s1 + $0x350] sm:$0xff]  ;;  %v789_v42 = vpack.c.bf16 %v213_v35, %v212_v34  ;;  %v214_v46 = vld [vmem:[%s1268_s1 + $0x3e0] sm:$0xff]  ;;  %v761_v50 = vpack.c.bf16 %v183_v45, %v182_v44 }
  0x34   :  { %786 = vmatprep.subr.bf16.mxu1 %v785_v30  ;;  %v197_v43 = vld [vmem:[%s1268_s1 + $0x358] sm:$0xff]  ;;  %v215_v47 = vld [vmem:[%s1268_s1 + $0x3e8] sm:$0xff]  ;;  %v759_v48 = vpack.c.bf16 %v165_v40, %v164_v39  ;;  %v166_v51 = vld [vmem:[%s1268_s1 + $0x260] sm:$0xff] }
  0x35   :  { %v791_v49 = vpack.c.bf16 %v197_v43, %v196_v41  ;;  %v167_v52 = vld [vmem:[%s1268_s1 + $0x268] sm:$0xff]  ;;  %v198_v53 = vld [vmem:[%s1268_s1 + $0x360] sm:$0xff]  ;;  %v793_v54 = vpack.c.bf16 %v215_v47, %v214_v46  ;;  %v184_v56 = vld [vmem:[%s1268_s1 + $0x2f0] sm:$0xff] }
  0x36   :  { %756 = vmatpush3.bf16.msra.mxu0 %v755_v36  ;;  %v199_v55 = vld [vmem:[%s1268_s1 + $0x368] sm:$0xff]  ;;  %v185_v57 = vld [vmem:[%s1268_s1 + $0x2f8] sm:$0xff]  ;;  %v216_v58 = vld [vmem:[%s1268_s1 + $0x3f0] sm:$0xff]  ;;  %v763_v60 = vpack.c.bf16 %v167_v52, %v166_v51 }
  0x37   :  { %788 = vmatpush3.bf16.msra.mxu1 %v787_v37  ;;  %758 = vmatprep.subr.bf16.mxu0 %v757_v38  ;;  %v217_v59 = vld [vmem:[%s1268_s1 + $0x3f8] sm:$0xff]  ;;  %v795_v61 = vpack.c.bf16 %v199_v55, %v198_v53  ;;  %v765_v62 = vpack.c.bf16 %v185_v57, %v184_v56  ;;  %v168_v63 = vld [vmem:[%s1268_s1 + $0x270] sm:$0xff]  ;;  %v86_v6 = vld [vmem:[%s1267_s0 + $0x20] sm:$0xff] }
  0x38   :  { %790 = vmatprep.subr.bf16.mxu1 %v789_v42  ;;  %v169_v0 = vld [vmem:[%s1268_s1 + $0x278] sm:$0xff]  ;;  %v797_v1 = vpack.c.bf16 %v217_v59, %v216_v58  ;;  %v200_v2 = vld [vmem:[%s1268_s1 + $0x370] sm:$0xff]  ;;  %v218_v23 = vld [vmem:[#allocation2] sm:$0xff] }
  0x39   :  { %v201_v3 = vld [vmem:[%s1268_s1 + $0x378] sm:$0xff]  ;;  %v767_v4 = vpack.c.bf16 %v169_v0, %v168_v63  ;;  %v88_v7 = vld [vmem:[%s1267_s0 + $0x30] sm:$0xff]  ;;  %s828_s0 = smov [#allocation3]  }
  0x3a   :  { %760 = vmatpush3.bf16.msra.mxu0 %v759_v48  ;;  %v799_v5 = vpack.c.bf16 %v201_v3, %v200_v2  ;;  %s513_s1 = sshll.u32 %s828_s0, 4  ;;  %s514_s1 = int_to_ptr.vmem [resolvable:$true] %s513_s1 }
  0x3b   :  { %792 = vmatpush3.bf16.msra.mxu1 %v791_v49  ;;  %762 = vmatprep.subr.bf16.mxu0 %v761_v50  ;;  %s803_s29 = scalar_lea.vmem %s514_s1, 128  ;;  %p808_p1 = scmp.lt.s32.totalorder %s514_s1, %s514_s1 }
  0x3c   :  { %794 = vmatprep.subr.bf16.mxu1 %v793_v54  ;;  %p804_p0 = scmp.ne.s32.totalorder %s514_s1, %s803_s29  ;;  %p809_p2 = scmp.lt.s32.totalorder %s803_s29, %s803_s29 }
  0x3e   :  { %764 = vmatpush3.bf16.msra.mxu0 %v763_v60  ;;  %p810_p3 = por %p809_p2, %p808_p1 }
  0x3f   :  { %796 = vmatpush3.bf16.msra.mxu1 %v795_v61  ;;  %766 = vmatprep.subr.bf16.mxu0 %v765_v62 }
  0x40   :  { %798 = vmatprep.subr.bf16.mxu1 %v797_v1  ;;  %p811_p4 = pnand %p810_p3, %p804_p0 }
  0x42   :  { %768 = vmatpush3.bf16.msra.mxu0 %v767_v4 }
  0x43   :  { %800 = vmatpush3.bf16.msra.mxu1 %v799_v5 }
  0x45   :  { %424 = vmatmul.mubr.f32.vlgmr.msra.gmra.mrb[2].mxu0 %v86_v6 }
  0x46   :  { %494 = vmatmul.mubr.f32.vlgmr.msra.gmra.mrb[2].mxu1 %v88_v7 }
  0xf8   :  { %v565_v9 = vpop.f32.mrb[0].mxu0 }
  0xf9   :  { %v600_v10 = vpop.f32.mrb[0].mxu1  ;;  %v566_v11 = vpop.f32.mrb[1].mxu0 }
  0xfa   :  { %v567_v12 = vadd.f32 %v566_v11, %v565_v9  ;;  %v601_v13 = vpop.f32.mrb[1].mxu1 }
  0xfb   :  { %v602_v14 = vadd.f32 %v601_v13, %v600_v10 }
  0xfd   :  { %v356_v15 = vadd.f32 %v602_v14, %v567_v12 }
 0x118   :  { %v635_v16 = vpop.f32.mrb[2].mxu0 }
 0x119   :  { %v636_v17 = vpop.f32.mrb[3].mxu0  ;;  %v670_v18 = vpop.f32.mrb[2].mxu1 }
 0x11a   :  { %v637_v19 = vadd.f32 %v636_v17, %v635_v16  ;;  %v671_v20 = vpop.f32.mrb[3].mxu1 }
 0x11b   :  { %v672_v21 = vadd.f32 %v671_v20, %v670_v18 }
 0x11c   :  { %v426_v22 = vadd.f32 %v637_v19, %v356_v15 }
 0x11e   :  { %v496_v24 = vadd.f32 %v672_v21, %v426_v22 }
 0x120   :  { %v499_v25 = vadd.f32 %v496_v24, %v218_v23 }
 0x122   :  { %501 = vst.msk [vmem:[#allocation2] sm:$0xff] %vm80_vm0, %v499_v25 }
 0x129   :  { %v505_v26 = vld [vmem:[#allocation2] sm:$0xff] }
 0x12a   :  { %506 = vst.msk [vmem:[#allocation3] sm:$0xff] %vm80_vm0, %v505_v26 }
 0x12b   :  { %814 = shalt.err (!%p811_p4)
}
 0x12c   :  { %s815_s4 = scalar_lea.hbm %s1269_s2, 128 }
 0x12d   :  { %p816_p5 = scmp.ne.s32.totalorder %s1269_s2, %s815_s4  ;;  %p819_p6 = scmp.lt.u32.totalorder %s815_s4, %s1269_s2 }
 0x12f   :  { %p821_p7 = pnand %p819_p6, %p816_p5 }
 0x131   :  { %824 = shalt.err (!%p821_p7)
}
 0x132   :  { %516 = dma.vmem_to_hbm [thread:$0]  %s514_s1, 128, %s1269_s2, [#allocation4]  }
 0x133   :  { %825 = dma.done.wait [#allocation4], 128  }
 0x134   :  { %826 = vsyncadd [#allocation4], 4294967168 }
 0x135   :  { %520 = vsyncpa [#allocation4], 1 }

</bundles_post_ra>
